<compile_context>
chip_gen: v5e
topology: v5e:2x2
jax: 0.10.0
libtpu: 0.0.40
codegen_flags: <defaults>
</compile_context>

<pallas_src>
import functools

import jax
import jax.numpy as jnp
import numpy as np
from jax import lax
from jax.experimental import pallas as pl
from jax.experimental.pallas import tpu as pltpu

LANES = 128        # every (packed) channel dim is padded to one full vreg of lanes
KSZ = 4            # kernel size of all three ConvTranspose2d layers
PAD = KSZ - 1      # stride=1, padding=0 transposed conv == full conv with PAD zeros


def _round8(n):
    return ((n + 7) // 8) * 8


# ---------------------------------------------------------------------------
# pltpu.roll direction probe (run once, outside jit).
# ---------------------------------------------------------------------------
def _roll_probe_kernel(x_ref, lane_ref, sub_ref):
    lane_ref[...] = pltpu.roll(x_ref[...], shift=1, axis=1)
    sub_ref[...] = pltpu.roll(x_ref[...], shift=1, axis=0)


def probe_roll_signs():
    x = jnp.arange(8 * LANES, dtype=jnp.float32).reshape(8, LANES)
    lane, sub = pl.pallas_call(
        _roll_probe_kernel,
        out_shape=(jax.ShapeDtypeStruct((8, LANES), jnp.float32),
                   jax.ShapeDtypeStruct((8, LANES), jnp.float32)),
    )(x)
    xn = np.asarray(x)
    lane_sign = 1 if np.array_equal(np.asarray(lane), np.roll(xn, 1, axis=1)) else -1
    sub_sign = 1 if np.array_equal(np.asarray(sub), np.roll(xn, 1, axis=0)) else -1
    return lane_sign, sub_sign


# ---------------------------------------------------------------------------
# Kernel pieces
# ---------------------------------------------------------------------------
def _conv_layer(src_ref, w_ref, b_ref, *, Wp, Hout, rows_per_blk, emit):
    """One ConvTranspose2d(stride=1, pad=0) layer over a q-packed padded plane.

    src_ref : ((Hout+PAD)*Wp, 128) bf16.  Row r holds, lane-concatenated (q major,
              channel minor), the input channels of padded columns r..r+PAD, so each
              height tap p is a single (rows,128)@(128,128) matmul.
    w_ref   : (KSZ, 128, 128) bf16; w_ref[p][q*Cin+ci, co] = flipped/packed weight.
    b_ref   : (1, 128) f32 bias (zero-padded lanes).
    emit(m0, nrows, mb, acc) consumes a finished f32 block of whole output rows.
    """
    bias = b_ref[...]
    for i0 in range(0, Hout, rows_per_blk):
        nrows = min(rows_per_blk, Hout - i0)
        mb = nrows * Wp
        m0 = i0 * Wp
        acc = None
        for p in range(KSZ):                     # only the 4 height taps remain
            xs = src_ref[pl.ds(m0 + p * Wp, mb), :]
            t = jnp.dot(xs, w_ref[p], preferred_element_type=jnp.float32)
            acc = t if acc is None else acc + t
        emit(m0, nrows, mb, acc + bias)


def _make_pack_emit(buf_next, *, Wp, Wout, Cout, lane_sign, sub_sign):
    """Fused epilogue: mask wrap columns -> SiLU -> scatter straight into the next
    layer's q-packed, zero-padded VMEM input buffer (one aligned lane-dense store)."""
    def emit(m0, nrows, mb, acc):
        # zero the wrap-around (invalid) columns of each output row
        rowmask = (lax.broadcasted_iota(jnp.int32, (Wp, LANES), 0) < Wout
                   ).astype(jnp.float32)
        if nrows > 1:
            rowmask = jnp.concatenate([rowmask] * nrows, axis=0)
        acc = acc * rowmask
        act = acc * jax.nn.sigmoid(acc)          # fused SiLU in f32 (lanes >= Cout stay 0)
        packed = None
        for q in range(KSZ):
            piece = act
            if q:                                 # place channels at lanes [q*Cout, ...)
                piece = pltpu.roll(piece, shift=(lane_sign * q * Cout) % LANES, axis=1)
            if PAD - q:                           # shift rows down by PAD-q (wraps zeros)
                piece = pltpu.roll(piece, shift=(sub_sign * (PAD - q)) % mb, axis=0)
            packed = piece if packed is None else packed + piece
        buf_next[pl.ds(m0 + PAD * Wp, mb), :] = packed.astype(jnp.bfloat16)
    return emit


def _make_out_emit(o_ref):
    def emit(m0, nrows, mb, acc):
        o_ref[pl.ds(m0, mb), :] = acc            # lane-dense, sublane-aligned store
    return emit


def _fused_kernel(x_ref, w1_ref, b1_ref, w2_ref, b2_ref, w3_ref, b3_ref,
                  o_ref, buf2, buf3, *, Wp, geom, lane_sign, sub_sign):
    (Ho1, Wo1, C2), (Ho2, Wo2, C3), Ho3 = geom
    rpb = max(1, LANES // Wp)
    zb = PAD * Wp
    zband = jnp.zeros((zb, LANES), jnp.bfloat16)

    # Re-zero only the top/bottom padding bands each grid step (scratch persists per
    # core); the interiors are fully overwritten by the fused repack below.
    buf2[pl.ds(0, zb), :] = zband
    buf2[pl.ds((PAD + Ho1) * Wp, zb), :] = zband
    buf3[pl.ds(0, zb), :] = zband
    buf3[pl.ds((PAD + Ho2) * Wp, zb), :] = zband

    # layer 1 (+ fused SiLU) -> packed VMEM input of layer 2
    _conv_layer(x_ref, w1_ref, b1_ref, Wp=Wp, Hout=Ho1, rows_per_blk=rpb,
                emit=_make_pack_emit(buf2, Wp=Wp, Wout=Wo1, Cout=C2,
                                     lane_sign=lane_sign, sub_sign=sub_sign))
    # layer 2 (+ fused SiLU) -> packed VMEM input of layer 3
    _conv_layer(buf2, w2_ref, b2_ref, Wp=Wp, Hout=Ho2, rows_per_blk=rpb,
                emit=_make_pack_emit(buf3, Wp=Wp, Wout=Wo2, Cout=C3,
                                     lane_sign=lane_sign, sub_sign=sub_sign))
    # layer 3 (no activation): store straight to the HBM output block
    _conv_layer(buf3, w3_ref, b3_ref, Wp=Wp, Hout=Ho3, rows_per_blk=rpb,
                emit=_make_out_emit(o_ref))


# ---------------------------------------------------------------------------
# Host-side wrapper
# ---------------------------------------------------------------------------
def _prep_weight(wt):
    # wt: (Cin, Cout, K, K) PyTorch ConvTranspose2d layout
    # -> (K, 128, 128) bf16 with w[p][q*Cin+ci, co] = wt[ci, co, K-1-p, K-1-q]
    cin, cout, k, _ = wt.shape
    w = jnp.transpose(jnp.flip(wt, axis=(2, 3)), (2, 3, 0, 1))    # (K,K,Cin,Cout)
    w = w.reshape(k, k * cin, cout)
    w = jnp.pad(w, ((0, 0), (0, LANES - k * cin), (0, LANES - cout)))
    return w.astype(jnp.bfloat16)


def _prep_bias(b):
    return jnp.pad(b, (0, LANES - b.shape[0])).reshape(1, LANES).astype(jnp.float32)


@functools.partial(jax.jit, static_argnames=("lane_sign", "sub_sign"))
def model_forward(x_nchw, params, *, lane_sign=1, sub_sign=1):
    """Pallas equivalent of Model.forward (all three layers fused in one kernel)."""
    (w1, b1), (w2, b2), (w3, b3) = params
    N, C1, H, W = x_nchw.shape
    C2, C3, C4 = w1.shape[1], w2.shape[1], w3.shape[1]

    # stride=1, padding=0 transposed conv geometry: out = in + K - 1
    Ho1, Wo1 = H + PAD, W + PAD
    Ho2, Wo2 = Ho1 + PAD, Wo1 + PAD
    Ho3, Wo3 = Ho2 + PAD, Wo2 + PAD
    Wp = _round8(W + 4 * PAD)          # one shared, 8-aligned padded plane width
    Hp1, Hp2, Hp3 = H + 2 * PAD, Ho1 + 2 * PAD, Ho2 + 2 * PAD
    R1, M3 = Hp1 * Wp, Ho3 * Wp

    # layer-1 input: NHWC, spatial zero pad, flatten, fold the K width taps onto lanes
    x = jnp.transpose(x_nchw, (0, 2, 3, 1))
    xp = jnp.pad(x, ((0, 0), (PAD, PAD), (PAD, Wp - W - PAD), (0, 0)))
    xf = jnp.pad(xp.reshape(N, R1, C1), ((0, 0), (0, PAD), (0, 0)))
    xq = jnp.concatenate([xf[:, q:q + R1, :] for q in range(KSZ)], axis=-1)
    xq = jnp.pad(xq, ((0, 0), (0, 0), (0, LANES - KSZ * C1))).astype(jnp.bfloat16)

    w1c, w2c, w3c = _prep_weight(w1), _prep_weight(w2), _prep_weight(w3)
    b1c, b2c, b3c = _prep_bias(b1), _prep_bias(b2), _prep_bias(b3)

    kernel = functools.partial(
        _fused_kernel, Wp=Wp,
        geom=((Ho1, Wo1, C2), (Ho2, Wo2, C3), Ho3),
        lane_sign=lane_sign, sub_sign=sub_sign)

    wspec = pl.BlockSpec((KSZ, LANES, LANES), lambda n: (0, 0, 0))
    bspec = pl.BlockSpec((1, LANES), lambda n: (0, 0))

    out_flat = pl.pallas_call(
        kernel,
        out_shape=jax.ShapeDtypeStruct((N, M3, LANES), jnp.float32),
        grid_spec=pltpu.PrefetchScalarGridSpec(
            num_scalar_prefetch=0, grid=(N,),
            in_specs=[
                pl.BlockSpec((None, R1, LANES), lambda n: (n, 0, 0)),
                wspec, bspec, wspec, bspec, wspec, bspec,
            ],
            out_specs=pl.BlockSpec((None, M3, LANES), lambda n: (n, 0, 0)),
            scratch_shapes=[
                pltpu.VMEM((Hp2 * Wp, LANES), jnp.bfloat16),   # packed input, layer 2
                pltpu.VMEM((Hp3 * Wp, LANES), jnp.bfloat16),   # packed input, layer 3
            ]),
        compiler_params=pltpu.CompilerParams(
            dimension_semantics=("parallel",)),                # one image per core (v7x)
    )(xq, w1c, b1c, w2c, b2c, w3c, b3c)

    # peel off wrap columns and lane padding; back to NCHW
    out = out_flat.reshape(N, Ho3, Wp, LANES)[:, :, :Wo3, :C4]
    return jnp.transpose(out, (0, 3, 1, 2))


# ---------------- pure-JAX reference (sanity check only) ----------------
def _convt_ref(x, w, b):
    k = w.shape[2]
    w_oihw = jnp.transpose(jnp.flip(w, axis=(2, 3)), (1, 0, 2, 3))
    y = lax.conv_general_dilated(
        x, w_oihw, window_strides=(1, 1),
        padding=[(k - 1, k - 1), (k - 1, k - 1)],
        dimension_numbers=("NCHW", "OIHW", "NCHW"))
    return y + b[None, :, None, None]


def _model_reference(x, params):
    (w1, b1), (w2, b2), (w3, b3) = params
    v1 = _convt_ref(x, w1, b1)
    v3 = v1 * jax.nn.sigmoid(v1)
    v4 = _convt_ref(v3, w2, b2)
    v6 = v4 * jax.nn.sigmoid(v4)
    return _convt_ref(v6, w3, b3)


def _init_convt_params(key, cin, cout, k):
    kw, kb = jax.random.split(key)
    bound = 1.0 / (cin * k * k) ** 0.5
    w = jax.random.uniform(kw, (cin, cout, k, k), jnp.float32, -bound, bound)
    b = jax.random.uniform(kb, (cout,), jnp.float32, -bound, bound)
    return w, b


if __name__ == "__main__":
    key = jax.random.PRNGKey(0)
    kx, k3, k4, k5 = jax.random.split(key, 4)

    # Small shapes consistent with the module: N=2, Cin=15, spatial 16x16.
    x = jax.random.normal(kx, (2, 15, 16, 16), jnp.float32)
    params = (
        _init_convt_params(k3, 15, 13, KSZ),   # conv_transpose_3
        _init_convt_params(k4, 13, 8, KSZ),    # conv_transpose_4
        _init_convt_params(k5, 8, 5, KSZ),     # conv_transpose_5
    )

    lane_sign, sub_sign = probe_roll_signs()

    out = model_forward(x, params, lane_sign=lane_sign, sub_sign=sub_sign)
    jax.block_until_ready(out)
    assert out.shape == (2, 5, 25, 25), out.shape

    ref = _model_reference(x, params)
    np.testing.assert_allclose(np.asarray(out), np.asarray(ref),
                               rtol=3e-2, atol=3e-2)
    print("KERNEL_OK")
</pallas_src>

<mosaic_0001>
module attributes {stable_mosaic.version = 11 : i64} {
  func.func @_roll_probe_kernel(%arg0: memref<8x128xf32, #tpu.memory_space<vmem>>, %arg1: memref<8x128xf32, #tpu.memory_space<vmem>>, %arg2: memref<8x128xf32, #tpu.memory_space<vmem>>) attributes {dimension_semantics = [], scalar_prefetch = 0 : i64, scratch_operands = 0 : i64, tpu.core_type = #tpu.core_type<tc>} {
    %c0 = arith.constant 0 : index
    %c0_0 = arith.constant 0 : index
    %0 = vector.load %arg0[%c0, %c0_0] : memref<8x128xf32, #tpu.memory_space<vmem>>, vector<8x128xf32>
    %c1_i32 = arith.constant 1 : i32
    %1 = tpu.dynamic_rotate %0 by %c1_i32 dim 1 : vector<8x128xf32>, i32 -> vector<8x128xf32>
    %c0_1 = arith.constant 0 : index
    %c0_2 = arith.constant 0 : index
    %2 = vector.load %arg1[%c0_1, %c0_2] : memref<8x128xf32, #tpu.memory_space<vmem>>, vector<8x128xf32>
    tpu.vector_store %arg1[%c0_1, %c0_2], %1 {strides = array<i32>} : memref<8x128xf32, #tpu.memory_space<vmem>>, vector<8x128xf32>,
    %c0_3 = arith.constant 0 : index
    %c0_4 = arith.constant 0 : index
    %3 = vector.load %arg0[%c0_3, %c0_4] : memref<8x128xf32, #tpu.memory_space<vmem>>, vector<8x128xf32>
    %c1_i32_5 = arith.constant 1 : i32
    %4 = tpu.dynamic_rotate %3 by %c1_i32_5 dim 0 : vector<8x128xf32>, i32 -> vector<8x128xf32>
    %c0_6 = arith.constant 0 : index
    %c0_7 = arith.constant 0 : index
    %5 = vector.load %arg2[%c0_6, %c0_7] : memref<8x128xf32, #tpu.memory_space<vmem>>, vector<8x128xf32>
    tpu.vector_store %arg2[%c0_6, %c0_7], %4 {strides = array<i32>} : memref<8x128xf32, #tpu.memory_space<vmem>>, vector<8x128xf32>,
    return
  }
}

</mosaic_0001>

<bundles_post_ra>
// kernel: tpu_custom_call.1
= control target key start
LH: loop header
LB: loop body
LE: loop exit
PB: predicated region body
PF: predicated region fallthrough
CT: control target
= control target key end

     0   :  { %8 = vsyncpa [#allocation3], 0  ;;  %s176_s0 = inlined_call_operand.hbm [shape: f32[8,128], index: 0, kind: input, shape index: {}]   ;;  %s177_s1 = inlined_call_operand.hbm [shape: f32[8,128], index: 1, kind: output, shape index: {0}]   ;;  %s178_s2 = inlined_call_operand.hbm [shape: f32[8,128], index: 2, kind: output, shape index: {1}]  }
   0x1   :  { %9 = vsyncpa [#allocation4], 0 }
   0x2   :  { %10 = vsyncpa [#allocation7], 0  ;;  %s16_s11 = sshll.u32 %s176_s0, 4  ;;  %s148_s12 = smov [#allocation2]   ;;  %s17_s11 = int_to_ptr.hbm [resolvable:$true] %s16_s11 }
   0x3   :  { %s18_s13 = sshll.u32 %s148_s12, 4  ;;  %s19_s13 = int_to_ptr.vmem [resolvable:$true] %s18_s13 }
   0x4   :  { %21 = dma.hbm_to_vmem [thread:$0]  %s17_s11, 128, %s19_s13, [#allocation3]  }
   0x5   :  { %142 = dma.done.wait [#allocation3], 128  }
   0x6   :  { %143 = vsyncadd [#allocation3], 4294967168  ;;  %v26_v0 = vld [vmem:[#allocation2] sm:$0xff]  ;;  %s149_s14 = smov 1   ;;  %s150_s15 = smov [#allocation6]  }
   0x7   :  { %27 = vrot.lane.b32.xlu0 %v26_v0, %s149_s14  ;;  %s49_s16 = sshll.u32 %s150_s15, 4  ;;  %s51_s19 = sshll.u32 %s178_s2, 4  ;;  %v31_v1 = vrot.slane %v26_v0, 7  ;;  %s50_s16 = int_to_ptr.vmem [resolvable:$true] %s49_s16  ;;  %s52_s19 = int_to_ptr.hbm [resolvable:$true] %s51_s19 }
   0x8   :  { %s151_s0 = smov [#allocation5]   ;;  %s40_s23 = sshll.u32 %s177_s1, 4  ;;  %s41_s23 = int_to_ptr.hbm [resolvable:$true] %s40_s23 }
   0x9   :  { %32 = vst [vmem:[#allocation6] sm:$0xff] %v31_v1  ;;  %s38_s20 = sshll.u32 %s151_s0, 4  ;;  %s39_s20 = int_to_ptr.vmem [resolvable:$true] %s38_s20 }
   0xa   :  { %54 = dma.vmem_to_hbm [thread:$0]  %s50_s16, 128, %s52_s19, [#allocation7]  }
  0x79   :  { %v28_v2 = vpop.permute.xlu0 %27 }
  0x7a   :  { %29 = vst [vmem:[#allocation5] sm:$0xff] %v28_v2 }
  0x7b   :  { %43 = dma.vmem_to_hbm [thread:$0]  %s39_s20, 128, %s41_s23, [#allocation4]  }
  0x7c   :  { %144 = dma.done.wait [#allocation4], 128  }
  0x7d   :  { %145 = vsyncadd [#allocation4], 4294967168 }
  0x7e   :  { %146 = dma.done.wait [#allocation7], 128  }
  0x7f   :  { %147 = vsyncadd [#allocation7], 4294967168 }
  0x80   :  { %63 = vsyncpa [#allocation3], 1 }
  0x81   :  { %64 = vsyncpa [#allocation4], 1 }
  0x82   :  { %65 = vsyncpa [#allocation7], 1 }

</bundles_post_ra>
